<compile_context>
chip_gen: v7x
topology: tpu7x:2x2x1
jax: 0.10.0
libtpu: 0.0.40
codegen_flags: <defaults>
</compile_context>

<pallas_src>
import jax
import jax.numpy as jnp
from jax.experimental import pallas as pl
from jax.experimental.pallas import tpu as pltpu


def _round_up(n, m):
    return ((n + m - 1) // m) * m


def autoencoder_kernel(x_ref,
                       w1_ref, b1_ref,
                       w2_ref, b2_ref,
                       w3_ref, b3_ref,
                       w4_ref, b4_ref,
                       o_ref):
    """Full forward pass for one batch tile; everything resident in VMEM.

    x arrives f32 and is cast to bf16 in-kernel (hidden under the input
    DMA).  Dots use bf16 operands with f32 accumulation on the MXU;
    bias-add and ReLU are done in f32 on the VPU, down-casting to bf16
    only at the next dot's inputs.
    """
    x = x_ref[...].astype(jnp.bfloat16)  # [tm, input_dim]

    # encoder: Linear -> ReLU -> Linear -> ReLU
    h1 = jnp.dot(x, w1_ref[...], preferred_element_type=jnp.float32) + b1_ref[...]
    h1 = jnp.maximum(h1, 0.0).astype(jnp.bfloat16)

    enc = jnp.dot(h1, w2_ref[...], preferred_element_type=jnp.float32) + b2_ref[...]
    enc = jnp.maximum(enc, 0.0).astype(jnp.bfloat16)

    # decoder: Linear -> ReLU -> Linear (no final activation)
    h2 = jnp.dot(enc, w3_ref[...], preferred_element_type=jnp.float32) + b3_ref[...]
    h2 = jnp.maximum(h2, 0.0).astype(jnp.bfloat16)

    dec = jnp.dot(h2, w4_ref[...], preferred_element_type=jnp.float32) + b4_ref[...]

    o_ref[...] = dec.astype(o_ref.dtype)  # [tm, input_dim] f32


def autoencoder_forward(x, params, *, tm=2048):
    """x: [B, input_dim] float32. params: dict of (W[in,out] f32, b[1,out] f32)."""
    B, input_dim = x.shape
    hidden_dim = params["w1"].shape[1]
    encoding_dim = params["w2"].shape[1]

    # --- batch tiling: no input pad, no output slice -----------------------
    tm = max(8, min(tm, _round_up(B, 8)))
    tm = _round_up(tm, 8)
    grid_steps = pl.cdiv(B, tm)
    # Prefer >=2 grid steps so v7x can shard batch tiles across both
    # TensorCores ("parallel" grid axis); only when the batch allows it.
    if grid_steps == 1 and B > 8:
        tm = _round_up(pl.cdiv(B, 2), 8)
        grid_steps = pl.cdiv(B, tm)
    grid = (grid_steps,)

    # --- bf16 weights for the MXU, f32 biases for the VPU ------------------
    w1 = params["w1"].astype(jnp.bfloat16)
    w2 = params["w2"].astype(jnp.bfloat16)
    w3 = params["w3"].astype(jnp.bfloat16)
    w4 = params["w4"].astype(jnp.bfloat16)
    b1 = params["b1"].astype(jnp.float32)
    b2 = params["b2"].astype(jnp.float32)
    b3 = params["b3"].astype(jnp.float32)
    b4 = params["b4"].astype(jnp.float32)

    # Constant index_map -> each weight/bias is DMA'd exactly once and
    # stays VMEM-resident across all batch tiles.
    const = lambda a: pl.BlockSpec(a.shape, lambda i: (0, 0))

    flops = 2 * B * (input_dim * hidden_dim
                     + hidden_dim * encoding_dim
                     + encoding_dim * hidden_dim
                     + hidden_dim * input_dim)
    bytes_accessed = (B * input_dim * 4            # x in (f32)
                      + B * input_dim * 4          # out (f32)
                      + 2 * (int(w1.size) + int(w2.size) + int(w3.size) + int(w4.size))
                      + 4 * (int(b1.size) + int(b2.size) + int(b3.size) + int(b4.size)))

    out = pl.pallas_call(
        autoencoder_kernel,
        out_shape=jax.ShapeDtypeStruct((B, input_dim), jnp.float32),
        grid=grid,
        in_specs=[
            pl.BlockSpec((tm, input_dim), lambda i: (i, 0)),
            const(w1), const(b1),
            const(w2), const(b2),
            const(w3), const(b3),
            const(w4), const(b4),
        ],
        out_specs=pl.BlockSpec((tm, input_dim), lambda i: (i, 0)),
        compiler_params=pltpu.CompilerParams(
            dimension_semantics=("parallel",)),
        cost_estimate=pl.CostEstimate(
            flops=flops, transcendentals=0, bytes_accessed=bytes_accessed),
    )(x, w1, b1, w2, b2, w3, b3, w4, b4)

    return out


def init_params(key, input_dim, encoding_dim=16, hidden_dim=64):
    """Deterministic synthetic parameters matching nn.Linear shapes.

    nn.Linear(in, out) has weight [out, in], bias [out]. We store the
    transposed weight [in, out] and bias as [1, out] for 2D broadcasting.
    """
    def linear(k, fan_in, fan_out):
        kw, kb = jax.random.split(k)
        bound = 1.0 / (fan_in ** 0.5)  # PyTorch default uniform init bound
        w = jax.random.uniform(kw, (fan_in, fan_out), jnp.float32, -bound, bound)
        b = jax.random.uniform(kb, (1, fan_out), jnp.float32, -bound, bound)
        return w, b

    k1, k2, k3, k4 = jax.random.split(key, 4)
    w1, b1 = linear(k1, input_dim, hidden_dim)
    w2, b2 = linear(k2, hidden_dim, encoding_dim)
    w3, b3 = linear(k3, encoding_dim, hidden_dim)
    w4, b4 = linear(k4, hidden_dim, input_dim)
    return {"w1": w1, "b1": b1, "w2": w2, "b2": b2,
            "w3": w3, "b3": b3, "w4": w4, "b4": b4}


def reference_forward(x, p):
    """Pure f32 reference (matches the PyTorch module semantics)."""
    relu = lambda t: jnp.maximum(t, 0.0)
    h1 = relu(x @ p["w1"] + p["b1"])
    enc = relu(h1 @ p["w2"] + p["b2"])
    h2 = relu(enc @ p["w3"] + p["b3"])
    return h2 @ p["w4"] + p["b4"]


if __name__ == "__main__":
    key = jax.random.PRNGKey(0)
    kx, kp = jax.random.split(key)

    # Small but non-trivial: B is not a multiple of the tile, so the
    # multi-step grid and the partial trailing block are exercised
    # (200 = 128 + 72 at tm=128).
    B, INPUT_DIM, ENCODING_DIM, HIDDEN_DIM = 200, 32, 16, 64
    x = jax.random.normal(kx, (B, INPUT_DIM), jnp.float32)
    params = init_params(kp, INPUT_DIM, ENCODING_DIM, HIDDEN_DIM)

    out = autoencoder_forward(x, params, tm=128)
    out = jax.block_until_ready(out)

    ref = reference_forward(x, params)
    assert out.shape == (B, INPUT_DIM)
    max_err = float(jnp.max(jnp.abs(out - ref)))
    # bf16 MXU operands with f32 accumulation: small relative error vs f32 ref.
    assert jnp.allclose(out, ref, atol=5e-2, rtol=5e-2), f"max abs err {max_err}"

    print("KERNEL_OK")
</pallas_src>

<mosaic_0001>
module attributes {stable_mosaic.version = 11 : i64} {
  func.func @autoencoder_kernel(%arg0: i32, %arg1: memref<128x32xf32, #tpu.memory_space<vmem>>, %arg2: memref<32x64xbf16, #tpu.memory_space<vmem>>, %arg3: memref<1x64xf32, #tpu.memory_space<vmem>>, %arg4: memref<64x16xbf16, #tpu.memory_space<vmem>>, %arg5: memref<1x16xf32, #tpu.memory_space<vmem>>, %arg6: memref<16x64xbf16, #tpu.memory_space<vmem>>, %arg7: memref<1x64xf32, #tpu.memory_space<vmem>>, %arg8: memref<64x32xbf16, #tpu.memory_space<vmem>>, %arg9: memref<1x32xf32, #tpu.memory_space<vmem>>, %arg10: memref<128x32xf32, #tpu.memory_space<vmem>>) attributes {dimension_semantics = [#tpu.dimension_semantics<parallel>], iteration_bounds = array<i64: 2>, scalar_prefetch = 0 : i64, scratch_operands = 0 : i64, tpu.core_type = #tpu.core_type<tc>, window_params = [{transform_indices = @transform_0, window_bounds = array<i64: 128, 32>}, {pipeline_mode = #tpu.pipeline_mode<synchronous>, transform_indices = @transform_1, window_bounds = array<i64: 32, 64>}, {pipeline_mode = #tpu.pipeline_mode<synchronous>, transform_indices = @transform_2, window_bounds = array<i64: 1, 64>}, {pipeline_mode = #tpu.pipeline_mode<synchronous>, transform_indices = @transform_3, window_bounds = array<i64: 64, 16>}, {pipeline_mode = #tpu.pipeline_mode<synchronous>, transform_indices = @transform_4, window_bounds = array<i64: 1, 16>}, {pipeline_mode = #tpu.pipeline_mode<synchronous>, transform_indices = @transform_5, window_bounds = array<i64: 16, 64>}, {pipeline_mode = #tpu.pipeline_mode<synchronous>, transform_indices = @transform_6, window_bounds = array<i64: 1, 64>}, {pipeline_mode = #tpu.pipeline_mode<synchronous>, transform_indices = @transform_7, window_bounds = array<i64: 64, 32>}, {pipeline_mode = #tpu.pipeline_mode<synchronous>, transform_indices = @transform_8, window_bounds = array<i64: 1, 32>}, {transform_indices = @transform_9, window_bounds = array<i64: 128, 32>}]} {
    %c0 = arith.constant 0 : index
    %c0_0 = arith.constant 0 : index
    %0 = vector.load %arg1[%c0, %c0_0] : memref<128x32xf32, #tpu.memory_space<vmem>>, vector<128x32xf32>
    %1 = arith.truncf %0 : vector<128x32xf32> to vector<128x32xbf16>
    %c0_1 = arith.constant 0 : index
    %c0_2 = arith.constant 0 : index
    %2 = vector.load %arg2[%c0_1, %c0_2] : memref<32x64xbf16, #tpu.memory_space<vmem>>, vector<32x64xbf16>
    %cst = arith.constant dense<0.000000e+00> : vector<128x64xf32>
    %3 = tpu.matmul %1, %2, %cst {dimension_numbers = #tpu.dot_dimension_numbers<[1], [0], [0], [1], [0, 0, 1, 1], [], []>} : vector<128x32xbf16>, vector<32x64xbf16>, vector<128x64xf32> -> vector<128x64xf32>
    %c0_3 = arith.constant 0 : index
    %c0_4 = arith.constant 0 : index
    %4 = vector.load %arg3[%c0_3, %c0_4] : memref<1x64xf32, #tpu.memory_space<vmem>>, vector<1x64xf32>
    %5 = vector.broadcast %4 : vector<1x64xf32> to vector<128x64xf32>
    %6 = arith.addf %3, %5 : vector<128x64xf32>
    %cst_5 = arith.constant 0.000000e+00 : f32
    %7 = vector.broadcast %cst_5 : f32 to vector<128x64xf32>
    %8 = arith.maximumf %6, %7 : vector<128x64xf32>
    %9 = arith.truncf %8 : vector<128x64xf32> to vector<128x64xbf16>
    %c0_6 = arith.constant 0 : index
    %c0_7 = arith.constant 0 : index
    %10 = vector.load %arg4[%c0_6, %c0_7] : memref<64x16xbf16, #tpu.memory_space<vmem>>, vector<64x16xbf16>
    %cst_8 = arith.constant dense<0.000000e+00> : vector<128x16xf32>
    %11 = tpu.matmul %9, %10, %cst_8 {dimension_numbers = #tpu.dot_dimension_numbers<[1], [0], [0], [1], [0, 0, 1, 1], [], []>} : vector<128x64xbf16>, vector<64x16xbf16>, vector<128x16xf32> -> vector<128x16xf32>
    %c0_9 = arith.constant 0 : index
    %c0_10 = arith.constant 0 : index
    %12 = vector.load %arg5[%c0_9, %c0_10] : memref<1x16xf32, #tpu.memory_space<vmem>>, vector<1x16xf32>
    %13 = vector.broadcast %12 : vector<1x16xf32> to vector<128x16xf32>
    %14 = arith.addf %11, %13 : vector<128x16xf32>
    %cst_11 = arith.constant 0.000000e+00 : f32
    %15 = vector.broadcast %cst_11 : f32 to vector<128x16xf32>
    %16 = arith.maximumf %14, %15 : vector<128x16xf32>
    %17 = arith.truncf %16 : vector<128x16xf32> to vector<128x16xbf16>
    %c0_12 = arith.constant 0 : index
    %c0_13 = arith.constant 0 : index
    %18 = vector.load %arg6[%c0_12, %c0_13] : memref<16x64xbf16, #tpu.memory_space<vmem>>, vector<16x64xbf16>
    %cst_14 = arith.constant dense<0.000000e+00> : vector<128x64xf32>
    %19 = tpu.matmul %17, %18, %cst_14 {dimension_numbers = #tpu.dot_dimension_numbers<[1], [0], [0], [1], [0, 0, 1, 1], [], []>} : vector<128x16xbf16>, vector<16x64xbf16>, vector<128x64xf32> -> vector<128x64xf32>
    %c0_15 = arith.constant 0 : index
    %c0_16 = arith.constant 0 : index
    %20 = vector.load %arg7[%c0_15, %c0_16] : memref<1x64xf32, #tpu.memory_space<vmem>>, vector<1x64xf32>
    %21 = vector.broadcast %20 : vector<1x64xf32> to vector<128x64xf32>
    %22 = arith.addf %19, %21 : vector<128x64xf32>
    %cst_17 = arith.constant 0.000000e+00 : f32
    %23 = vector.broadcast %cst_17 : f32 to vector<128x64xf32>
    %24 = arith.maximumf %22, %23 : vector<128x64xf32>
    %25 = arith.truncf %24 : vector<128x64xf32> to vector<128x64xbf16>
    %c0_18 = arith.constant 0 : index
    %c0_19 = arith.constant 0 : index
    %26 = vector.load %arg8[%c0_18, %c0_19] : memref<64x32xbf16, #tpu.memory_space<vmem>>, vector<64x32xbf16>
    %cst_20 = arith.constant dense<0.000000e+00> : vector<128x32xf32>
    %27 = tpu.matmul %25, %26, %cst_20 {dimension_numbers = #tpu.dot_dimension_numbers<[1], [0], [0], [1], [0, 0, 1, 1], [], []>} : vector<128x64xbf16>, vector<64x32xbf16>, vector<128x32xf32> -> vector<128x32xf32>
    %c0_21 = arith.constant 0 : index
    %c0_22 = arith.constant 0 : index
    %28 = vector.load %arg9[%c0_21, %c0_22] : memref<1x32xf32, #tpu.memory_space<vmem>>, vector<1x32xf32>
    %29 = vector.broadcast %28 : vector<1x32xf32> to vector<128x32xf32>
    %30 = arith.addf %27, %29 : vector<128x32xf32>
    %c0_23 = arith.constant 0 : index
    %c0_24 = arith.constant 0 : index
    %31 = vector.load %arg10[%c0_23, %c0_24] : memref<128x32xf32, #tpu.memory_space<vmem>>, vector<128x32xf32>
    tpu.vector_store %arg10[%c0_23, %c0_24], %30 {strides = array<i32>} : memref<128x32xf32, #tpu.memory_space<vmem>>, vector<128x32xf32>,
    return
  }
  func.func @transform_0(%arg0: i32) -> (i32, i32) {
    %c0_i32 = arith.constant 0 : i32
    %c0_i32_0 = arith.constant 0 : i32
    return %arg0, %c0_i32 : i32, i32
  }
  func.func @transform_1(%arg0: i32) -> (i32, i32) {
    %c0_i32 = arith.constant 0 : i32
    %c0_i32_0 = arith.constant 0 : i32
    %c0_i32_1 = arith.constant 0 : i32
    return %c0_i32, %c0_i32_0 : i32, i32
  }
  func.func @transform_2(%arg0: i32) -> (i32, i32) {
    %c0_i32 = arith.constant 0 : i32
    %c0_i32_0 = arith.constant 0 : i32
    %c0_i32_1 = arith.constant 0 : i32
    return %c0_i32, %c0_i32_0 : i32, i32
  }
  func.func @transform_3(%arg0: i32) -> (i32, i32) {
    %c0_i32 = arith.constant 0 : i32
    %c0_i32_0 = arith.constant 0 : i32
    %c0_i32_1 = arith.constant 0 : i32
    return %c0_i32, %c0_i32_0 : i32, i32
  }
  func.func @transform_4(%arg0: i32) -> (i32, i32) {
    %c0_i32 = arith.constant 0 : i32
    %c0_i32_0 = arith.constant 0 : i32
    %c0_i32_1 = arith.constant 0 : i32
    return %c0_i32, %c0_i32_0 : i32, i32
  }
  func.func @transform_5(%arg0: i32) -> (i32, i32) {
    %c0_i32 = arith.constant 0 : i32
    %c0_i32_0 = arith.constant 0 : i32
    %c0_i32_1 = arith.constant 0 : i32
    return %c0_i32, %c0_i32_0 : i32, i32
  }
  func.func @transform_6(%arg0: i32) -> (i32, i32) {
    %c0_i32 = arith.constant 0 : i32
    %c0_i32_0 = arith.constant 0 : i32
    %c0_i32_1 = arith.constant 0 : i32
    return %c0_i32, %c0_i32_0 : i32, i32
  }
  func.func @transform_7(%arg0: i32) -> (i32, i32) {
    %c0_i32 = arith.constant 0 : i32
    %c0_i32_0 = arith.constant 0 : i32
    %c0_i32_1 = arith.constant 0 : i32
    return %c0_i32, %c0_i32_0 : i32, i32
  }
  func.func @transform_8(%arg0: i32) -> (i32, i32) {
    %c0_i32 = arith.constant 0 : i32
    %c0_i32_0 = arith.constant 0 : i32
    %c0_i32_1 = arith.constant 0 : i32
    return %c0_i32, %c0_i32_0 : i32, i32
  }
  func.func @transform_9(%arg0: i32) -> (i32, i32) {
    %c0_i32 = arith.constant 0 : i32
    %c0_i32_0 = arith.constant 0 : i32
    return %arg0, %c0_i32 : i32, i32
  }
}

</mosaic_0001>

<bundles_post_ra>
// kernel: tpu_custom_call.1
= control target key start
LH: loop header
LB: loop body
LE: loop exit
PB: predicated region body
PF: predicated region fallthrough
CT: control target
= control target key end

     0   :  { %s1785_s30 = smov 0   ;;  %s1787_s10 = smov 0   ;;  %s2052_s0 = inlined_call_operand.vmem [shape: f32[200,32], index: 0, kind: input, shape index: {}]   ;;  %s2053_s1 = inlined_call_operand.vmem [shape: bf16[32,64], index: 1, kind: input, shape index: {}]   ;;  %s2054_s2 = inlined_call_operand.vmem [shape: f32[1,64], index: 2, kind: input, shape index: {}]   ;;  %s2055_s3 = inlined_call_operand.vmem [shape: bf16[64,16], index: 3, kind: input, shape index: {}]   ;;  %s2056_s4 = inlined_call_operand.vmem [shape: f32[1,16], index: 4, kind: input, shape index: {}]   ;;  %s2057_s5 = inlined_call_operand.vmem [shape: bf16[16,64], index: 5, kind: input, shape index: {}]   ;;  %s2058_s6 = inlined_call_operand.vmem [shape: f32[1,64], index: 6, kind: input, shape index: {}]   ;;  %s2059_s7 = inlined_call_operand.vmem [shape: bf16[64,32], index: 7, kind: input, shape index: {}]   ;;  %s2060_s8 = inlined_call_operand.vmem [shape: f32[1,32], index: 8, kind: input, shape index: {}]   ;;  %s2061_s9 = inlined_call_operand.vmem [shape: f32[200,32], index: 9, kind: output, shape index: {}]  }
   0x1   :  { %s1789_s11 = smov 0  }
   0x2 LB: > { %s1798_s12 = sadd.s32 4294967295, %s1701_s11   ;;  %s1800_s13 = sadd.s32 1, %s1701_s11   ;;  %s1701_s11 = sphi %s1789_s11, %s2068_s11   ;;  %s1697_s10 = sphi %s1787_s10, %s2067_s10   ;;  %s1693_s30 = sphi %s1785_s30, %s2066_s30  }
   0x3   : > { %s217_s14 = ssub.s32 %s1701_s11, %s1800_s13  ;;  %s220_s15 = sadd.s32 1, %s1697_s10 }
   0x4   : > { %p218_p0 = scmp.eq.s32.totalorder %s217_s14, 0  ;;  %p230_p1 = scmp.ne.s32.totalorder %s1697_s10, %s1693_s30 }
   0x5   : > { %p231_p2 = scmp.eq.s32.totalorder %s1798_s12, 1  ;;  %p1348_p3 = scmp.ge.s32.totalorder %s1701_s11, 1 }
   0x6   : > { %s1808_s16 = scalar_select %p218_p0, %s1697_s10, %s220_s15  }
   0x7   : > { %p1810_p4 = por %p231_p2, %p230_p1  ;;  %p296_p5 = scmp.lt.s32.totalorder %s1701_s11, 3 }
   0x9   : > { %p297_p6 = pnand %p1348_p3, %p296_p5 }
   0xa   : > { %v1636_v0 = vld [vmem:[%s2053_s1] sm:$0xff] (!%p297_p6)   ;;  %s1818_s20 = sshll.u32 (!%p297_p6), %s1798_s12, 4  ;;  %v1637_v1 = vld [vmem:[%s2053_s1 + $0x8] sm:$0xff] (!%p297_p6)   ;;  %vm402_vm0 = vcmask (!%p297_p6), 261120   ;;  %v1640_v28 = vld [vmem:[%s2055_s3 + $0x10] sm:$0xff] (!%p297_p6)   ;;  %vm587_vm1 = vcmask (!%p297_p6), 523264  }
   0xb   : > { %300 = sbr.rel (%p297_p6) target bundleno = 983 (0x3d7), region = 56  ;;  %p340_p7 = scmp.lt.s32.totalorder (!%p297_p6), %s1818_s20, 24  ;;  %1462 = vmatprep.subr.bf16.mxu0 (!%p297_p6), %v1636_v0  ;;  %v1638_v2 = vld [vmem:[%s2055_s3] sm:$0xff] (!%p297_p6)   ;;  %v1639_v3 = vld [vmem:[%s2055_s3 + $0x8] sm:$0xff] (!%p297_p6)   ;;  %v1641_v29 = vld [vmem:[%s2055_s3 + $0x18] sm:$0xff] (!%p297_p6)   ;;  %vm748_vm2 = vcmask (!%p297_p6), 130048  }
   0xc   : > { %1463 = vmatpush3.bf16.msra.mxu0 (!%p297_p6), %v1636_v0  ;;  %1482 = vmatprep.subr.bf16.mxu1 (!%p297_p6), %v1638_v2  ;;  %v1642_v30 = vld [vmem:[%s2057_s5] sm:$0xff] (!%p297_p6)   ;;  %s332_s24 = sand.u32 (!%p297_p6), 1, %s1693_s30  }
   0xd   : > { %1464 = vmatprep.subr.bf16.mxu0 (!%p297_p6), %v1637_v1  ;;  %1483 = vmatpush3.bf16.msra.mxu1 (!%p297_p6), %v1638_v2  ;;  %v1352_v31 = vld [vmem:[%s2054_s2] ss:$0 sm:$0xff] (!%p297_p6) }
   0xe   : > { %1484 = vmatprep.subr.bf16.mxu1 (!%p297_p6), %v1639_v3 }
  0x10   : > { %1465 = vmatpush3.bf16.msra.mxu0 (!%p297_p6), %v1637_v1 }
  0x11   : > { %1485 = vmatpush3.bf16.msra.mxu1 (!%p297_p6), %v1639_v3  ;;  %1506 = vmatprep.subr.bf16.mxu0 (!%p297_p6), %v1642_v30 }
  0x12   : > { %s341_s25 = scalar_select %p340_p7, %s1818_s20, 24  ;;  %1486 = vmatprep.subr.bf16.mxu1 %v1640_v28 }
  0x13   : > { %s1078_s30 = ssub.s32 (%p1810_p4), 25, %s1818_s20  ;;  %s1416_s29 = sshll.u32 (%p1810_p4), %s1798_s12, 7 }
  0x14   : > { %s1351_s28 = sshll.u32 %s341_s25, 3  ;;  %s1349_s25 = sshll.u32 %s332_s24, 7 }
  0x15   : > { %s1834_s14 = scalar_lea.vmem %s2052_s0, %s1351_s28  ;;  %1487 = vmatpush3.bf16.msra.mxu1 %v1640_v28  ;;  %s1918_s28 = scalar_lea.vmem [#allocation2], %s1349_s25  }
  0x16   : > { %v355_v4 = vld [vmem:[%s1834_s14] sm:$0xff]  ;;  %v356_v5 = vld [vmem:[%s1834_s14 + $0x8] sm:$0xff]  ;;  %v357_v6 = vld [vmem:[%s1834_s14 + $0x10] sm:$0xff]  ;;  %1488 = vmatprep.subr.bf16.mxu1 %v1641_v29  ;;  %p1079_p8 = scmp.lt.s32.totalorder (%p1810_p4), %s1078_s30, 16  ;;  %s1959_s15 = scalar_lea.vmem (%p1810_p4), %s2061_s9, %s1416_s29  }
  0x17   : > { %v371_v7 = vpack.c.bf16 %v356_v5, %v355_v4  ;;  %v358_v8 = vld [vmem:[%s1834_s14 + $0x18] sm:$0xff]  ;;  %v359_v9 = vld [vmem:[%s1834_s14 + $0x20] sm:$0xff]  ;;  %v360_v10 = vld [vmem:[%s1834_s14 + $0x28] sm:$0xff] }
  0x18   : > { %v372_v11 = vpack.c.bf16 %v358_v8, %v357_v6  ;;  %v373_v12 = vpack.c.bf16 %v360_v10, %v359_v9  ;;  %v361_v13 = vld [vmem:[%s1834_s14 + $0x30] sm:$0xff]  ;;  %v362_v14 = vld [vmem:[%s1834_s14 + $0x38] sm:$0xff]  ;;  %v363_v15 = vld [vmem:[%s1834_s14 + $0x40] sm:$0xff] }
  0x19   : > { %1466 = vmatprep.mubr.msk.bf16.mxu0 %vm402_vm0, %v371_v7  ;;  %v364_v16 = vld [vmem:[%s1834_s14 + $0x48] sm:$0xff]  ;;  %v374_v17 = vpack.c.bf16 %v362_v14, %v361_v13  ;;  %v365_v19 = vld [vmem:[%s1834_s14 + $0x50] sm:$0xff]  ;;  %v366_v20 = vld [vmem:[%s1834_s14 + $0x58] sm:$0xff]  ;;  %1489 = vmatpush3.bf16.msra.mxu1 %v1641_v29 }
  0x1a   : > { %1467 = vmatmul.mubr.msk.bf16.vlgmr.msra.gmra.mrb[0].mxu0 %vm402_vm0, %v372_v11  ;;  %v375_v18 = vpack.c.bf16 %v364_v16, %v363_v15  ;;  %v367_v21 = vld [vmem:[%s1834_s14 + $0x60] sm:$0xff]  ;;  %v368_v22 = vld [vmem:[%s1834_s14 + $0x68] sm:$0xff]  ;;  %v376_v23 = vpack.c.bf16 %v366_v20, %v365_v19  ;;  %v369_v25 = vld [vmem:[%s1834_s14 + $0x70] sm:$0xff] }
  0x1b   : > { %1470 = vmatprep.mubr.msk.bf16.mxu0 %vm402_vm0, %v373_v12  ;;  %v377_v24 = vpack.c.bf16 %v368_v22, %v367_v21  ;;  %v370_v26 = vld [vmem:[%s1834_s14 + $0x78] sm:$0xff]  ;;  %1507 = vmatpush3.bf16.msra.mxu0 %v1642_v30 }
  0x1c   : > { %v378_v27 = vpack.c.bf16 %v370_v26, %v369_v25  ;;  %v1644_v25 = vld [vmem:[%s2059_s7 + $0x8] sm:$0xff]   ;;  %v1645_v26 = vld [vmem:[%s2059_s7 + $0x10] sm:$0xff]  }
  0x22   : > { %1471 = vmatmul.mubr.msk.bf16.gmra.mrb[4].mxu0 %vm402_vm0, %v374_v17 }
  0x23   : > { %1474 = vmatprep.mubr.msk.bf16.mxu0 %vm402_vm0, %v375_v18 }
  0x2a   : > { %1475 = vmatmul.mubr.msk.bf16.gmra.mrb[8].mxu0 %vm402_vm0, %v376_v23 }
  0x2b   : > { %1478 = vmatprep.mubr.msk.bf16.mxu0 %vm402_vm0, %v377_v24  ;;  %v1643_v24 = vld [vmem:[%s2059_s7] sm:$0xff]  }
  0x2c   : > { %1524 = vmatprep.subr.bf16.mxu1 %v1643_v24 }
  0x32   : > { %1479 = vmatmul.mubr.msk.bf16.gmra.mrb[12].mxu0 %vm402_vm0, %v378_v27  ;;  %v1363_v27 = vld [vmem:[%s2056_s4] ss:$0 sm:$0xff] }
  0xed   : > { %v1468_v32 = vpop.f32.mrb[0].mxu0 }
  0xee   : > { %v470_v33 = vadd.f32 %v1468_v32, %v1352_v31  ;;  %v461_v34 = vpop.f32.mrb[1].mxu0 }
  0xef   : > { %v462_v35 = vadd.f32 %v1352_v31, %v461_v34  ;;  %v1469_v36 = vpop.f32.mrb[2].mxu0 }
  0xf0   : > { %v473_v37 = vadd.f32 %v1469_v36, %v1352_v31  ;;  %v464_v38 = vpop.f32.mrb[3].mxu0  ;;  %v526_v40 = vmax.f32 %v470_v33, 0.0 }
  0xf1   : > { %v465_v39 = vadd.f32 %v1352_v31, %v464_v38  ;;  %v524_v42 = vmax.f32 %v462_v35, 0.0 }
  0xf2   : > { %v527_v41 = vmax.f32 %v473_v37, 0.0 }
  0xf3   : > { %v525_v43 = vmax.f32 %v465_v39, 0.0 }
  0xf4   : > { %v541_v44 = vpack.c.bf16 %v527_v41, %v526_v40 }
  0xf5   : > { %v1472_v45 = vpop.f32.mrb[4].mxu0  ;;  %v540_v46 = vpack.c.bf16 %v525_v43, %v524_v42 }
  0xf6   : > { %v486_v47 = vadd.f32 %v1472_v45, %v1352_v31  ;;  %v477_v48 = vpop.f32.mrb[5].mxu0 }
  0xf7   : > { %v478_v49 = vadd.f32 %v1352_v31, %v477_v48  ;;  %v1473_v50 = vpop.f32.mrb[6].mxu0  ;;  %1490 = vmatprep.mubr.msk.bf16.mxu1 %vm587_vm1, %v540_v46 }
  0xf8   : > { %v489_v51 = vadd.f32 %v1473_v50, %v1352_v31  ;;  %v480_v52 = vpop.f32.mrb[7].mxu0  ;;  %1491 = vmatmul.mubr.msk.bf16.vlgmr.msra.gmra.mrb[0].mxu1 %vm587_vm1, %v541_v44  ;;  %v530_v54 = vmax.f32 %v486_v47, 0.0 }
  0xf9   : > { %v481_v53 = vadd.f32 %v1352_v31, %v480_v52  ;;  %v528_v56 = vmax.f32 %v478_v49, 0.0  ;;  %1525 = vmatpush3.bf16.msra.mxu1 %v1643_v24 }
  0xfa   : > { %v531_v55 = vmax.f32 %v489_v51, 0.0  ;;  %1526 = vmatprep.subr.bf16.mxu1 %v1644_v25 }
  0xfb   : > { %v529_v57 = vmax.f32 %v481_v53, 0.0 }
  0xfc   : > { %v543_v58 = vpack.c.bf16 %v531_v55, %v530_v54 }
  0xfd   : > { %v542_v59 = vpack.c.bf16 %v529_v57, %v528_v56  ;;  %v1476_v60 = vpop.f32.mrb[8].mxu0  ;;  %1527 = vmatpush3.bf16.msra.mxu1 %v1644_v25 }
  0xfe   : > { %v502_v61 = vadd.f32 %v1476_v60, %v1352_v31  ;;  %v493_v62 = vpop.f32.mrb[9].mxu0  ;;  %1528 = vmatprep.subr.bf16.mxu1 %v1645_v26 }
  0xff   : > { %v494_v63 = vadd.f32 %v1352_v31, %v493_v62  ;;  %v1477_v0 = vpop.f32.mrb[10].mxu0  ;;  %1494 = vmatprep.mubr.msk.bf16.mxu1 %vm587_vm1, %v542_v59 }
 0x100   : > { %v505_v1 = vadd.f32 %v1477_v0, %v1352_v31  ;;  %v496_v2 = vpop.f32.mrb[11].mxu0  ;;  %1495 = vmatmul.mubr.msk.bf16.gmra.mrb[4].mxu1 %vm587_vm1, %v543_v58  ;;  %v534_v4 = vmax.f32 %v502_v61, 0.0 }
 0x101   : > { %v497_v3 = vadd.f32 %v1352_v31, %v496_v2  ;;  %v532_v6 = vmax.f32 %v494_v63, 0.0  ;;  %1529 = vmatpush3.bf16.msra.mxu1 %v1645_v26 }
 0x102   : > { %v535_v5 = vmax.f32 %v505_v1, 0.0 }
 0x103   : > { %v533_v7 = vmax.f32 %v497_v3, 0.0 }
 0x104   : > { %v545_v8 = vpack.c.bf16 %v535_v5, %v534_v4 }
 0x105   : > { %v544_v9 = vpack.c.bf16 %v533_v7, %v532_v6  ;;  %v1480_v10 = vpop.f32.mrb[12].mxu0 }
 0x106   : > { %v518_v11 = vadd.f32 %v1480_v10, %v1352_v31  ;;  %v509_v12 = vpop.f32.mrb[13].mxu0 }
 0x107   : > { %v510_v13 = vadd.f32 %v1352_v31, %v509_v12  ;;  %v1481_v14 = vpop.f32.mrb[14].mxu0  ;;  %1498 = vmatprep.mubr.msk.bf16.mxu1 %vm587_vm1, %v544_v9 }
 0x108   : > { %v521_v15 = vadd.f32 %v1481_v14, %v1352_v31  ;;  %v512_v16 = vpop.f32.mrb[15].mxu0  ;;  %1499 = vmatmul.mubr.msk.bf16.gmra.mrb[8].mxu1 %vm587_vm1, %v545_v8  ;;  %v538_v18 = vmax.f32 %v518_v11, 0.0 }
 0x109   : > { %v513_v17 = vadd.f32 %v1352_v31, %v512_v16  ;;  %v536_v20 = vmax.f32 %v510_v13, 0.0 }
 0x10a   : > { %v539_v19 = vmax.f32 %v521_v15, 0.0 }
 0x10b   : > { %v537_v21 = vmax.f32 %v513_v17, 0.0 }
 0x10c   : > { %v547_v22 = vpack.c.bf16 %v539_v19, %v538_v18 }
 0x10d   : > { %v546_v23 = vpack.c.bf16 %v537_v21, %v536_v20  ;;  %v1646_v20 = vld [vmem:[%s2059_s7 + $0x18] sm:$0xff]   ;;  %v1376_v21 = vld [vmem:[%s2058_s6] ss:$0 sm:$0xff] }
 0x10e   : > { %1530 = vmatprep.subr.bf16.mxu1 %v1646_v20 }
 0x10f   : > { %1502 = vmatprep.mubr.msk.bf16.mxu1 %vm587_vm1, %v546_v23  ;;  %1531 = vmatpush3.bf16.msra.mxu1 %v1646_v20 }
 0x110   : > { %1503 = vmatmul.mubr.msk.bf16.gmra.mrb[12].mxu1 %vm587_vm1, %v547_v22 }
 0x1cb   : > { %v1492_v28 = vpop.f32.mrb[0].mxu1 }
 0x1cc   : > { %v655_v29 = vadd.f32 %v1492_v28, %v1363_v27  ;;  %v646_v30 = vpop.f32.mrb[1].mxu1 }
 0x1cd   : > { %v647_v31 = vadd.f32 %v1363_v27, %v646_v30  ;;  %v1493_v32 = vpop.f32.mrb[2].mxu1 }
 0x1ce   : > { %v658_v33 = vadd.f32 %v1493_v32, %v1363_v27  ;;  %v649_v34 = vpop.f32.mrb[3].mxu1  ;;  %v711_v36 = vmax.f32 %v655_v29, 0.0 }
 0x1cf   : > { %v650_v35 = vadd.f32 %v1363_v27, %v649_v34  ;;  %v709_v38 = vmax.f32 %v647_v31, 0.0 }
 0x1d0   : > { %v712_v37 = vmax.f32 %v658_v33, 0.0 }
 0x1d1   : > { %v710_v39 = vmax.f32 %v650_v35, 0.0 }
 0x1d2   : > { %v726_v40 = vpack.c.bf16 %v712_v37, %v711_v36 }
 0x1d3   : > { %v725_v41 = vpack.c.bf16 %v710_v39, %v709_v38  ;;  %v1496_v42 = vpop.f32.mrb[4].mxu1 }
 0x1d4   : > { %v671_v43 = vadd.f32 %v1496_v42, %v1363_v27  ;;  %v662_v44 = vpop.f32.mrb[5].mxu1 }
 0x1d5   : > { %v663_v45 = vadd.f32 %v1363_v27, %v662_v44  ;;  %v1497_v46 = vpop.f32.mrb[6].mxu1  ;;  %1508 = vmatprep.mubr.msk.bf16.mxu0 %vm748_vm2, %v725_v41 }
 0x1d6   : > { %v674_v47 = vadd.f32 %v1497_v46, %v1363_v27  ;;  %v665_v48 = vpop.f32.mrb[7].mxu1  ;;  %1509 = vmatmul.mubr.msk.bf16.vlgmr.msra.gmra.mrb[16].mxu0 %vm748_vm2, %v726_v40  ;;  %v715_v50 = vmax.f32 %v671_v43, 0.0 }
 0x1d7   : > { %v666_v49 = vadd.f32 %v1363_v27, %v665_v48  ;;  %v713_v52 = vmax.f32 %v663_v45, 0.0 }
 0x1d8   : > { %v716_v51 = vmax.f32 %v674_v47, 0.0 }
 0x1d9   : > { %v714_v53 = vmax.f32 %v666_v49, 0.0 }
 0x1da   : > { %v728_v54 = vpack.c.bf16 %v716_v51, %v715_v50 }
 0x1db   : > { %v727_v55 = vpack.c.bf16 %v714_v53, %v713_v52  ;;  %v1500_v56 = vpop.f32.mrb[8].mxu1 }
 0x1dc   : > { %v687_v57 = vadd.f32 %v1500_v56, %v1363_v27  ;;  %v678_v58 = vpop.f32.mrb[9].mxu1 }
 0x1dd   : > { %v679_v59 = vadd.f32 %v1363_v27, %v678_v58  ;;  %v1501_v60 = vpop.f32.mrb[10].mxu1  ;;  %1512 = vmatprep.mubr.msk.bf16.mxu0 %vm748_vm2, %v727_v55 }
 0x1de   : > { %v690_v61 = vadd.f32 %v1501_v60, %v1363_v27  ;;  %v681_v62 = vpop.f32.mrb[11].mxu1  ;;  %1513 = vmatmul.mubr.msk.bf16.gmra.mrb[20].mxu0 %vm748_vm2, %v728_v54  ;;  %v719_v0 = vmax.f32 %v687_v57, 0.0 }
 0x1df   : > { %v682_v63 = vadd.f32 %v1363_v27, %v681_v62  ;;  %v717_v2 = vmax.f32 %v679_v59, 0.0 }
 0x1e0   : > { %v720_v1 = vmax.f32 %v690_v61, 0.0 }
 0x1e1   : > { %v718_v3 = vmax.f32 %v682_v63, 0.0 }
 0x1e2   : > { %v730_v4 = vpack.c.bf16 %v720_v1, %v719_v0 }
 0x1e3   : > { %v729_v5 = vpack.c.bf16 %v718_v3, %v717_v2  ;;  %v1504_v6 = vpop.f32.mrb[12].mxu1 }
 0x1e4   : > { %v703_v7 = vadd.f32 %v1504_v6, %v1363_v27  ;;  %v694_v8 = vpop.f32.mrb[13].mxu1 }
 0x1e5   : > { %v695_v9 = vadd.f32 %v1363_v27, %v694_v8  ;;  %v1505_v10 = vpop.f32.mrb[14].mxu1  ;;  %1516 = vmatprep.mubr.msk.bf16.mxu0 %vm748_vm2, %v729_v5 }
 0x1e6   : > { %v706_v11 = vadd.f32 %v1505_v10, %v1363_v27  ;;  %v697_v12 = vpop.f32.mrb[15].mxu1  ;;  %1517 = vmatmul.mubr.msk.bf16.gmra.mrb[24].mxu0 %vm748_vm2, %v730_v4  ;;  %v723_v14 = vmax.f32 %v703_v7, 0.0 }
 0x1e7   : > { %v698_v13 = vadd.f32 %v1363_v27, %v697_v12  ;;  %v721_v16 = vmax.f32 %v695_v9, 0.0 }
 0x1e8   : > { %v724_v15 = vmax.f32 %v706_v11, 0.0 }
 0x1e9   : > { %v722_v17 = vmax.f32 %v698_v13, 0.0 }
 0x1ea   : > { %v732_v18 = vpack.c.bf16 %v724_v15, %v723_v14  ;;  %v1386_v14 = vld [vmem:[%s2060_s8] ss:$0 sm:$0xff] }
 0x1eb   : > { %v731_v19 = vpack.c.bf16 %v722_v17, %v721_v16 }
 0x1ed   : > { %1520 = vmatprep.mubr.msk.bf16.mxu0 %vm748_vm2, %v731_v19 }
 0x1ee   : > { %1521 = vmatmul.mubr.msk.bf16.gmra.mrb[28].mxu0 %vm748_vm2, %v732_v18 }
 0x2a9   : > { %v1510_v22 = vpop.f32.mrb[16].mxu0 }
 0x2aa   : > { %v816_v23 = vadd.f32 %v1510_v22, %v1376_v21  ;;  %v807_v24 = vpop.f32.mrb[17].mxu0 }
 0x2ab   : > { %v808_v25 = vadd.f32 %v1376_v21, %v807_v24  ;;  %v1511_v26 = vpop.f32.mrb[18].mxu0 }
 0x2ac   : > { %v819_v27 = vadd.f32 %v1511_v26, %v1376_v21  ;;  %v810_v28 = vpop.f32.mrb[19].mxu0  ;;  %v872_v30 = vmax.f32 %v816_v23, 0.0 }
 0x2ad   : > { %v811_v29 = vadd.f32 %v1376_v21, %v810_v28  ;;  %v870_v32 = vmax.f32 %v808_v25, 0.0 }
 0x2ae   : > { %v873_v31 = vmax.f32 %v819_v27, 0.0 }
 0x2af   : > { %v871_v33 = vmax.f32 %v811_v29, 0.0 }
 0x2b0   : > { %v887_v34 = vpack.c.bf16 %v873_v31, %v872_v30 }
 0x2b1   : > { %v886_v35 = vpack.c.bf16 %v871_v33, %v870_v32  ;;  %v1514_v36 = vpop.f32.mrb[20].mxu0 }
 0x2b2   : > { %v832_v37 = vadd.f32 %v1514_v36, %v1376_v21  ;;  %v823_v38 = vpop.f32.mrb[21].mxu0 }
 0x2b3   : > { %v824_v39 = vadd.f32 %v1376_v21, %v823_v38  ;;  %v1515_v40 = vpop.f32.mrb[22].mxu0  ;;  %1532 = vmatprep.mubr.msk.bf16.mxu1 %vm587_vm1, %v886_v35 }
 0x2b4   : > { %v835_v41 = vadd.f32 %v1515_v40, %v1376_v21  ;;  %v826_v42 = vpop.f32.mrb[23].mxu0  ;;  %1533 = vmatmul.mubr.msk.bf16.vlgmr.msra.gmra.mrb[16].mxu1 %vm587_vm1, %v887_v34  ;;  %v876_v44 = vmax.f32 %v832_v37, 0.0 }
 0x2b5   : > { %v827_v43 = vadd.f32 %v1376_v21, %v826_v42  ;;  %v874_v46 = vmax.f32 %v824_v39, 0.0 }
 0x2b6   : > { %v877_v45 = vmax.f32 %v835_v41, 0.0 }
 0x2b7   : > { %v875_v47 = vmax.f32 %v827_v43, 0.0 }
 0x2b8   : > { %v889_v48 = vpack.c.bf16 %v877_v45, %v876_v44 }
 0x2b9   : > { %v888_v49 = vpack.c.bf16 %v875_v47, %v874_v46  ;;  %v1518_v50 = vpop.f32.mrb[24].mxu0 }
 0x2ba   : > { %v848_v51 = vadd.f32 %v1518_v50, %v1376_v21  ;;  %v839_v52 = vpop.f32.mrb[25].mxu0 }
 0x2bb   : > { %v840_v53 = vadd.f32 %v1376_v21, %v839_v52  ;;  %v1519_v54 = vpop.f32.mrb[26].mxu0  ;;  %1536 = vmatprep.mubr.msk.bf16.mxu1 %vm587_vm1, %v888_v49 }
 0x2bc   : > { %v851_v55 = vadd.f32 %v1519_v54, %v1376_v21  ;;  %v842_v56 = vpop.f32.mrb[27].mxu0  ;;  %1537 = vmatmul.mubr.msk.bf16.gmra.mrb[20].mxu1 %vm587_vm1, %v889_v48  ;;  %v880_v58 = vmax.f32 %v848_v51, 0.0 }
 0x2bd   : > { %v843_v57 = vadd.f32 %v1376_v21, %v842_v56  ;;  %v878_v60 = vmax.f32 %v840_v53, 0.0 }
 0x2be   : > { %v881_v59 = vmax.f32 %v851_v55, 0.0 }
 0x2bf   : > { %v879_v61 = vmax.f32 %v843_v57, 0.0 }
 0x2c0   : > { %v891_v62 = vpack.c.bf16 %v881_v59, %v880_v58 }
 0x2c1   : > { %v890_v63 = vpack.c.bf16 %v879_v61, %v878_v60  ;;  %v1522_v0 = vpop.f32.mrb[28].mxu0 }
 0x2c2   : > { %v864_v1 = vadd.f32 %v1522_v0, %v1376_v21  ;;  %v855_v2 = vpop.f32.mrb[29].mxu0 }
 0x2c3   : > { %v856_v3 = vadd.f32 %v1376_v21, %v855_v2  ;;  %v1523_v4 = vpop.f32.mrb[30].mxu0  ;;  %1540 = vmatprep.mubr.msk.bf16.mxu1 %vm587_vm1, %v890_v63 }
 0x2c4   : > { %v867_v5 = vadd.f32 %v1523_v4, %v1376_v21  ;;  %v858_v6 = vpop.f32.mrb[31].mxu0  ;;  %1541 = vmatmul.mubr.msk.bf16.gmra.mrb[24].mxu1 %vm587_vm1, %v891_v62  ;;  %v884_v8 = vmax.f32 %v864_v1, 0.0 }
 0x2c5   : > { %v859_v7 = vadd.f32 %v1376_v21, %v858_v6  ;;  %v882_v10 = vmax.f32 %v856_v3, 0.0 }
 0x2c6   : > { %v885_v9 = vmax.f32 %v867_v5, 0.0 }
 0x2c7   : > { %v883_v11 = vmax.f32 %v859_v7, 0.0 }
 0x2c8   : > { %v893_v12 = vpack.c.bf16 %v885_v9, %v884_v8 }
 0x2c9   : > { %v892_v13 = vpack.c.bf16 %v883_v11, %v882_v10 }
 0x2cb   : > { %1544 = vmatprep.mubr.msk.bf16.mxu1 %vm587_vm1, %v892_v13 }
 0x2cc   : > { %1545 = vmatmul.mubr.msk.bf16.gmra.mrb[28].mxu1 %vm587_vm1, %v893_v12 }
 0x387   : > { %v1534_v15 = vpop.f32.mrb[16].mxu1 }
 0x388   : > { %v1000_v16 = vadd.f32 %v1534_v15, %v1386_v14  ;;  %v991_v17 = vpop.f32.mrb[17].mxu1 }
 0x389   : > { %v992_v18 = vadd.f32 %v1386_v14, %v991_v17  ;;  %v1535_v19 = vpop.f32.mrb[18].mxu1 }
 0x38a   : > { %1056 = vst.msk [vmem:[%s1918_s28 + $0x10] sm:$0xff] %vm402_vm0, %v1000_v16  ;;  %v1003_v20 = vadd.f32 %v1535_v19, %v1386_v14  ;;  %v994_v21 = vpop.f32.mrb[19].mxu1 }
 0x38b   : > { %1054 = vst.msk [vmem:[%s1918_s28] sm:$0xff] %vm402_vm0, %v992_v18  ;;  %v995_v22 = vadd.f32 %v1386_v14, %v994_v21 }
 0x38c   : > { %1057 = vst.msk [vmem:[%s1918_s28 + $0x18] sm:$0xff] %vm402_vm0, %v1003_v20 }
 0x38d   : > { %1055 = vst.msk [vmem:[%s1918_s28 + $0x8] sm:$0xff] %vm402_vm0, %v995_v22 }
 0x38f   : > { %v1538_v23 = vpop.f32.mrb[20].mxu1 }
 0x390   : > { %v1016_v24 = vadd.f32 %v1538_v23, %v1386_v14  ;;  %v1007_v25 = vpop.f32.mrb[21].mxu1 }
 0x391   : > { %v1008_v26 = vadd.f32 %v1386_v14, %v1007_v25  ;;  %v1539_v27 = vpop.f32.mrb[22].mxu1 }
 0x392   : > { %1060 = vst.msk [vmem:[%s1918_s28 + $0x30] sm:$0xff] %vm402_vm0, %v1016_v24  ;;  %v1019_v28 = vadd.f32 %v1539_v27, %v1386_v14  ;;  %v1010_v29 = vpop.f32.mrb[23].mxu1 }
 0x393   : > { %1058 = vst.msk [vmem:[%s1918_s28 + $0x20] sm:$0xff] %vm402_vm0, %v1008_v26  ;;  %v1011_v30 = vadd.f32 %v1386_v14, %v1010_v29 }
 0x394   : > { %1061 = vst.msk [vmem:[%s1918_s28 + $0x38] sm:$0xff] %vm402_vm0, %v1019_v28 }
 0x395   : > { %1059 = vst.msk [vmem:[%s1918_s28 + $0x28] sm:$0xff] %vm402_vm0, %v1011_v30 }
 0x397   : > { %v1542_v31 = vpop.f32.mrb[24].mxu1 }
 0x398   : > { %v1032_v32 = vadd.f32 %v1542_v31, %v1386_v14  ;;  %v1023_v33 = vpop.f32.mrb[25].mxu1 }
 0x399   : > { %v1024_v34 = vadd.f32 %v1386_v14, %v1023_v33  ;;  %v1543_v35 = vpop.f32.mrb[26].mxu1 }
 0x39a   : > { %1064 = vst.msk [vmem:[%s1918_s28 + $0x50] sm:$0xff] %vm402_vm0, %v1032_v32  ;;  %v1035_v36 = vadd.f32 %v1543_v35, %v1386_v14  ;;  %v1026_v37 = vpop.f32.mrb[27].mxu1 }
 0x39b   : > { %1062 = vst.msk [vmem:[%s1918_s28 + $0x40] sm:$0xff] %vm402_vm0, %v1024_v34  ;;  %v1027_v38 = vadd.f32 %v1386_v14, %v1026_v37 }
 0x39c   : > { %1065 = vst.msk [vmem:[%s1918_s28 + $0x58] sm:$0xff] %vm402_vm0, %v1035_v36 }
 0x39d   : > { %1063 = vst.msk [vmem:[%s1918_s28 + $0x48] sm:$0xff] %vm402_vm0, %v1027_v38 }
 0x39f   : > { %v1546_v39 = vpop.f32.mrb[28].mxu1  ;;  %1076 = sbr.rel (!%p1810_p4) target bundleno = 983 (0x3d7), region = 60 }
 0x3a0   : > { %v1048_v40 = vadd.f32 %v1546_v39, %v1386_v14  ;;  %v1039_v41 = vpop.f32.mrb[29].mxu1 }
 0x3a1   : > { %v1040_v42 = vadd.f32 %v1386_v14, %v1039_v41  ;;  %v1547_v43 = vpop.f32.mrb[30].mxu1 }
 0x3a2   : > { %1068 = vst.msk [vmem:[%s1918_s28 + $0x70] sm:$0xff] %vm402_vm0, %v1048_v40  ;;  %v1051_v44 = vadd.f32 %v1547_v43, %v1386_v14  ;;  %v1042_v45 = vpop.f32.mrb[31].mxu1 }
 0x3a3   : > { %1066 = vst.msk [vmem:[%s1918_s28 + $0x60] sm:$0xff] %vm402_vm0, %v1040_v42  ;;  %v1043_v46 = vadd.f32 %v1386_v14, %v1042_v45 }
 0x3a4   : > { %1069 = vst.msk [vmem:[%s1918_s28 + $0x78] sm:$0xff] %vm402_vm0, %v1051_v44 }
 0x3a5   : > { %1067 = vst.msk [vmem:[%s1918_s28 + $0x68] sm:$0xff] %vm402_vm0, %v1043_v46 }
 0x3a6   : > { %s2070_s30 = smov (!%p1079_p8, %s1078_s30), 16 }
 0x3a7   : > { %s1401_s18 = sshll.u32 %s2070_s30, 7 }
 0x3a8   : > { %p1404_p9 = scmp.eq.s32.totalorder %s1401_s18, 0 }
 0x3a9   : > { %s1965_s19 = sshrl.u32 (!%p1404_p9), %s2070_s30, 4 }
 0x3aa   : > { %1087 = sbr.rel (%p1404_p9) target bundleno = 983 (0x3d7), region = 64  ;;  %p1405_p10 = scmp.le.s32.totalorder (!%p1404_p9), %s1965_s19, 0 }
 0x3b1   : > { %1301 = sbr.rel (%p1405_p10) target bundleno = 962 (0x3c2), region = 140  ;;  %s2063_s12 = smov (!%p1405_p10), %s1959_s15 }
 0x3b2   : > { %s2064_s17 = smov (!%p1405_p10), %s1918_s28  ;;  %s1974_s20 = smov (!%p1405_p10), 0  }
 0x3b3   : > { %s1976_s21 = smov (!%p1405_p10), 0  }
 0x3b8 LB: >> { %v1179_v47 = vld [vmem:[%s1709_s17] sm:$0xff]  ;;  %v1181_v48 = vld [vmem:[%s1709_s17 + $0x8] sm:$0xff]  ;;  %v1183_v49 = vld [vmem:[%s1709_s17 + $0x10] sm:$0xff]  ;;  %s1211_s22 = sadd.s32 1, %s1713_s20  ;;  %s1173_s21 = sadd.s32 1, %s1717_s21   ;;  %s1717_s21 = sphi %s1976_s21, %s1173_s21   ;;  %s1713_s20 = sphi %s1974_s20, %s2065_s20   ;;  %s1709_s17 = sphi %s2064_s17, %s1216_s17   ;;  %s1705_s12 = sphi %s2063_s12, %s1217_s12  }
 0x3b9   : >> { %1180 = vst [vmem:[%s1705_s12] sm:$0xff] %v1179_v47  ;;  %1182 = vst [vmem:[%s1705_s12 + $0x8] sm:$0xff] %v1181_v48  ;;  %v1185_v50 = vld [vmem:[%s1709_s17 + $0x18] sm:$0xff]  ;;  %v1187_v51 = vld [vmem:[%s1709_s17 + $0x20] sm:$0xff]  ;;  %p1212_p11 = scmp.ge.s32.totalorder %s1211_s22, %s1965_s19  ;;  %p1172_p12 = scmp.ge.s32.totalorder %s1173_s21, %s1965_s19 }
 0x3ba   : >> { %1184 = vst [vmem:[%s1705_s12 + $0x10] sm:$0xff] %v1183_v49  ;;  %v1189_v52 = vld [vmem:[%s1709_s17 + $0x28] sm:$0xff]  ;;  %1186 = vst [vmem:[%s1705_s12 + $0x18] sm:$0xff] %v1185_v50  ;;  %v1191_v53 = vld [vmem:[%s1709_s17 + $0x30] sm:$0xff] }
 0x3bb   : >> { %1188 = vst [vmem:[%s1705_s12 + $0x20] sm:$0xff] %v1187_v51  ;;  %1190 = vst [vmem:[%s1705_s12 + $0x28] sm:$0xff] %v1189_v52  ;;  %v1193_v54 = vld [vmem:[%s1709_s17 + $0x38] sm:$0xff]  ;;  %v1195_v55 = vld [vmem:[%s1709_s17 + $0x40] sm:$0xff]  ;;  %s2072_s22 = smov (%p1212_p11, %s1211_s22), 0  ;;  %1175 = sbr.rel (!%p1172_p12) target bundleno = 952 (0x3b8), region = 146 }
 0x3bc   : >> { %1192 = vst [vmem:[%s1705_s12 + $0x30] sm:$0xff] %v1191_v53  ;;  %1194 = vst [vmem:[%s1705_s12 + $0x38] sm:$0xff] %v1193_v54  ;;  %v1197_v56 = vld [vmem:[%s1709_s17 + $0x48] sm:$0xff]  ;;  %v1199_v57 = vld [vmem:[%s1709_s17 + $0x50] sm:$0xff]  ;;  %s1406_s23 = sshll.u32 %s2072_s22, 7  ;;  %s2065_s20 = smov %s2072_s22 }
 0x3bd   : >> { %1196 = vst [vmem:[%s1705_s12 + $0x40] sm:$0xff] %v1195_v55  ;;  %v1201_v58 = vld [vmem:[%s1709_s17 + $0x58] sm:$0xff]  ;;  %1198 = vst [vmem:[%s1705_s12 + $0x48] sm:$0xff] %v1197_v56  ;;  %v1203_v59 = vld [vmem:[%s1709_s17 + $0x60] sm:$0xff] }
 0x3be   : >> { %1200 = vst [vmem:[%s1705_s12 + $0x50] sm:$0xff] %v1199_v57  ;;  %1202 = vst [vmem:[%s1705_s12 + $0x58] sm:$0xff] %v1201_v58  ;;  %v1205_v60 = vld [vmem:[%s1709_s17 + $0x68] sm:$0xff]  ;;  %v1207_v61 = vld [vmem:[%s1709_s17 + $0x70] sm:$0xff] }
 0x3bf   : >> { %1204 = vst [vmem:[%s1705_s12 + $0x60] sm:$0xff] %v1203_v59  ;;  %1206 = vst [vmem:[%s1705_s12 + $0x68] sm:$0xff] %v1205_v60  ;;  %v1209_v62 = vld [vmem:[%s1709_s17 + $0x78] sm:$0xff]  ;;  %s1216_s17 = scalar_lea.vmem %s1918_s28, %s1406_s23 [#allocation2]  }
 0x3c0   : >> { %1208 = vst [vmem:[%s1705_s12 + $0x70] sm:$0xff] %v1207_v61  ;;  %1210 = vst [vmem:[%s1705_s12 + $0x78] sm:$0xff] %v1209_v62  ;;  %s1217_s12 = scalar_lea.vmem %s1959_s15, %s1406_s23  }
 0x3c2 PF: > { %s2034_s24 = sand.u32 15, %s2070_s30   ;;  %s1417_s25 = sshll.u32 %s1965_s19, 7 }
 0x3c3   : > { %s1222_s26 = scalar_lea.vmem %s1918_s28, %s1417_s25 [#allocation2]   ;;  %s1224_s27 = scalar_lea.vmem %s1959_s15, %s1417_s25  }
 0x3c4   : > { %p1411_p13 = scmp.le.s32.totalorder %s2034_s24, 0 }
 0x3c5   : > { %s1719_s29 = smov (!%p1411_p13), %s1224_s27   ;;  %s1723_s11 = smov (!%p1411_p13), %s1222_s26  }
 0x3c6   : > { %1315 = sbr.rel (%p1411_p13) target bundleno = 983 (0x3d7), region = 151  ;;  %s1727_s14 = smov (!%p1411_p13), 0  }
 0x3c7   : > { %s1731_s18 = smov (!%p1411_p13), 0  }
 0x3cd LB: >> { %v1234_v63 = vld [vmem:[%s1725_s11] sm:$0xff]  ;;  %s1236_s30 = sadd.s32 1, %s1729_s14  ;;  %s1228_s18 = sadd.s32 1, %s1733_s18   ;;  %s1733_s18 = sphi %s1731_s18, %s1228_s18   ;;  %s1729_s14 = sphi %s1727_s14, %s1728_s14   ;;  %s1725_s11 = sphi %s1723_s11, %s1241_s11   ;;  %s1721_s29 = sphi %s1719_s29, %s1242_s29  }
 0x3ce   : >> { %1235 = vst [vmem:[%s1721_s29] sm:$0xff] %v1234_v63  ;;  %p1237_p0 = scmp.ge.s32.totalorder %s1236_s30, %s2034_s24  ;;  %p1227_p1 = scmp.ge.s32.totalorder %s1228_s18, %s2034_s24 }
 0x3d0   : >> { %s2074_s30 = smov (%p1237_p0, %s1236_s30), 0  ;;  %1230 = sbr.rel (!%p1227_p1) target bundleno = 973 (0x3cd), region = 157 }
 0x3d1   : >> { %s1412_s28 = sshll.u32 %s2074_s30, 3  ;;  %s1728_s14 = smov %s2074_s30  }
 0x3d2   : >> { %s1241_s11 = scalar_lea.vmem %s1222_s26, %s1412_s28 [#allocation2]   ;;  %s1242_s29 = scalar_lea.vmem %s1224_s27, %s1412_s28  }
 0x3d7 PF: > { %p16_p2 = scmp.ge.s32.totalorder %s1800_s13, 4   ;;  %s2066_s30 = smov %s1697_s10 }
 0x3d8   : > { %s2067_s10 = smov %s1808_s16  ;;  %s2068_s11 = smov %s1800_s13 }
 0x3d9   :  { %18 = sbr.rel (!%p16_p2) target bundleno = 2 (0x2), region = 168 }

</bundles_post_ra>
